<compile_context>
chip_gen: v7x
topology: tpu7x:2x2x1
jax: 0.10.0
libtpu: 0.0.40
codegen_flags: <defaults>
</compile_context>

<pallas_src>
from math import sqrt

import jax
import jax.numpy as jnp
from jax.experimental import pallas as pl
from jax.experimental.pallas import tpu as pltpu


def _rmsnorm(v, scale):
    # F.normalize(v, dim=-1) * dim**-0.5   (p=2, eps=1e-12), f32 math.
    nrm = jnp.maximum(jnp.sqrt(jnp.sum(v * v, axis=-1, keepdims=True)), 1e-12)
    return (v / nrm) * scale


def _vmem_limit(needed_bytes: int) -> int:
    # actual requirement + headroom, clamped; stays sane on v7x's 64 MiB physical VMEM for the
    # shapes exercised here while allowing bigger tiles on v5e/v6e (128 MiB physical).
    return int(min(max(needed_bytes + (8 << 20), 32 << 20), 100 << 20))


# --------------------- stage 1: RMSNorm + fused Q / KV projections (once) ---------------------
def _make_proj_kernel(embed_dim: int):
    norm_scale = embed_dim ** (-0.5)

    def kernel(x_ref, wq_ref, bq_ref, wkv_ref, bkv_ref, q_ref, kv_ref):
        xn = _rmsnorm(x_ref[0].astype(jnp.float32), norm_scale).astype(jnp.bfloat16)
        q_ref[0] = (jnp.dot(xn, wq_ref[...], preferred_element_type=jnp.float32)
                    + bq_ref[...]).astype(jnp.bfloat16)
        kv_ref[0] = (jnp.dot(xn, wkv_ref[...], preferred_element_type=jnp.float32)
                     + bkv_ref[...]).astype(jnp.bfloat16)

    return kernel


# ------------- stage 2: flash-style differential attention + Wo + FFN epilogue ---------------
def _make_attn_ffn_kernel(heads: int, embed_dim: int):
    H, D = heads, embed_dim
    HD = H * D
    norm_scale = D ** (-0.5)
    # bound per-head vreg live ranges with fori_loop when there are many lane-aligned heads
    use_fori = (H >= 4) and (D % 128 == 0)

    def _nt(a, b):
        # a @ b.T with f32 accumulation on the MXU (no explicit transpose materialized).
        return jax.lax.dot_general(a, b, (((1,), (1,)), ((), ())),
                                   preferred_element_type=jnp.float32)

    def kernel(x_ref, q_ref, kv_ref, lam_ref,
               wo_ref, bo_ref, w1_ref, w2_ref, w3_ref,
               o_ref,
               m1_s, l1_s, acc1_s, m2_s, l2_s, acc2_s, diff_s):
        ki = pl.program_id(2)

        # ---- first K/V tile for this query tile: reset online-softmax state ----
        @pl.when(ki == 0)
        def _():
            m1_s[...] = jnp.full_like(m1_s, -jnp.inf)
            m2_s[...] = jnp.full_like(m2_s, -jnp.inf)
            l1_s[...] = jnp.zeros_like(l1_s)
            l2_s[...] = jnp.zeros_like(l2_s)
            acc1_s[...] = jnp.zeros_like(acc1_s)
            acc2_s[...] = jnp.zeros_like(acc2_s)

        # ---- every step: online-softmax update for both differential softmaxes ----
        def update_head(h, lo):
            vh = kv_ref[0, :, pl.ds(2 * HD + lo, D)]             # (TK, D) bf16

            # softmax 1  (scale already folded into Q in the pre-pass)
            s1 = _nt(q_ref[0, :, pl.ds(lo, D)], kv_ref[0, :, pl.ds(lo, D)])
            m1n = jnp.maximum(m1_s[h], s1.max(axis=-1, keepdims=True))
            a1 = jnp.exp(m1_s[h] - m1n)
            p1 = jnp.exp(s1 - m1n)
            l1_s[h] = a1 * l1_s[h] + p1.sum(axis=-1, keepdims=True)
            acc1_s[h] = a1 * acc1_s[h] + jnp.dot(
                p1.astype(jnp.bfloat16), vh, preferred_element_type=jnp.float32)
            m1_s[h] = m1n

            # softmax 2
            s2 = _nt(q_ref[0, :, pl.ds(HD + lo, D)], kv_ref[0, :, pl.ds(HD + lo, D)])
            m2n = jnp.maximum(m2_s[h], s2.max(axis=-1, keepdims=True))
            a2 = jnp.exp(m2_s[h] - m2n)
            p2 = jnp.exp(s2 - m2n)
            l2_s[h] = a2 * l2_s[h] + p2.sum(axis=-1, keepdims=True)
            acc2_s[h] = a2 * acc2_s[h] + jnp.dot(
                p2.astype(jnp.bfloat16), vh, preferred_element_type=jnp.float32)
            m2_s[h] = m2n

        if use_fori:
            def body(h, carry):
                update_head(h, pl.multiple_of(h * D, 128))
                return carry
            jax.lax.fori_loop(0, H, body, 0)
        else:
            for h in range(H):                                   # H small -> static unroll
                update_head(h, h * D)

        # ---- last K/V tile: normalize, diff-combine, wide Wo matmul, residual, FFN, residual ----
        @pl.when(ki == pl.num_programs(2) - 1)
        def _():
            def finalize_head(h, lo):
                out1 = acc1_s[h] * pl.reciprocal(l1_s[h], approx=True)
                out2 = acc2_s[h] * pl.reciprocal(l2_s[h], approx=True)
                diff_s[:, pl.ds(lo, D)] = (out1 - lam_ref[h] * out2).astype(jnp.bfloat16)

            if use_fori:
                def body(h, carry):
                    finalize_head(h, pl.multiple_of(h * D, 128))
                    return carry
                jax.lax.fori_loop(0, H, body, 0)
            else:
                for h in range(H):
                    finalize_head(h, h * D)

            x_res = x_ref[0].astype(jnp.float32)                 # (TQ, D) residual
            # Wo / bo pre-scaled by (1 - lambda_init); ONE wide (TQ,H*D)@(H*D,D) matmul.
            attn = (jnp.dot(diff_s[...], wo_ref[...], preferred_element_type=jnp.float32)
                    + bo_ref[...])
            attended = attn + x_res                              # residual 1

            xn2 = _rmsnorm(attended, norm_scale).astype(jnp.bfloat16)
            h1 = jax.nn.silu(jnp.dot(xn2, w1_ref[...], preferred_element_type=jnp.float32))
            h3 = jnp.dot(xn2, w3_ref[...], preferred_element_type=jnp.float32)
            ffn = jnp.dot((h1 * h3).astype(jnp.bfloat16), w2_ref[...],
                          preferred_element_type=jnp.float32)
            o_ref[0] = (ffn + attended).astype(o_ref.dtype)      # residual 2

    return kernel


def differential_transformer_block(x, params, *, heads: int, lambda_init: float,
                                   q_tile: int = 256, kv_tile: int = 256):
    """x: (B, N, D) float32.  Default 256 tiles target v6e/v7x MXU width; use 128 on v5e."""
    B, N, D = x.shape
    H = heads
    HD = H * D
    bf16, f32 = jnp.bfloat16, jnp.float32

    TQ = N if N <= q_tile else q_tile
    TK = N if N <= kv_tile else kv_tile
    assert N % TQ == 0 and N % TK == 0, "sequence length must divide the tile sizes"
    num_q, num_kv = N // TQ, N // TK

    # ---------------- parameter glue (plain JAX; hoist once per model in practice) ----------------
    def head_major(w):   # (H, O, D) -> (D, H*O): per-head x @ w[h].T slabs laid side by side
        return jnp.transpose(w, (2, 0, 1)).reshape(D, -1)

    attn_scale = 1.0 / sqrt(D)                      # folded into the Q projection
    out_scale = 1.0 - lambda_init                   # folded into Wo / bo

    wq, wk, wv = params["wq"], params["wk"], params["wv"]
    # fused projection slabs: Q -> [q1 | q2], KV -> [k1 | k2 | v]  (single wide matmuls)
    wq_cat = (jnp.concatenate([head_major(wq[:, :D, :]), head_major(wq[:, D:, :])], axis=1)
              * attn_scale).astype(bf16)                                     # (D, 2*H*D)
    bq_cat = (jnp.concatenate([params["bq"][:, :D].reshape(1, HD),
                               params["bq"][:, D:].reshape(1, HD)], axis=1)
              * attn_scale).astype(f32)                                      # (1, 2*H*D)
    wkv_cat = jnp.concatenate([head_major(wk[:, :D, :]), head_major(wk[:, D:, :]),
                               head_major(wv)], axis=1).astype(bf16)         # (D, 3*H*D)
    bkv_cat = jnp.concatenate([params["bk"][:, :D].reshape(1, HD),
                               params["bk"][:, D:].reshape(1, HD),
                               params["bv"].reshape(1, HD)], axis=1).astype(f32)

    wo = (params["wo"].T * out_scale).astype(bf16)                           # (H*D, D)
    bo = (params["bo"] * out_scale)[None, :].astype(f32)                     # (1, D)
    w1 = params["w1"].T.astype(bf16)                                         # (D, 4D)
    w2 = params["w2"].T.astype(bf16)                                         # (4D, D)
    w3 = params["w3"].T.astype(bf16)                                         # (D, 4D)

    # per-head lambda_full (tiny scalar reduction, read from SMEM in-kernel)
    lam = (jnp.exp(jnp.sum(params["lambda_q1"] * params["lambda_k1"], axis=-1))
           - jnp.exp(jnp.sum(params["lambda_q2"] * params["lambda_k2"], axis=-1))
           + lambda_init).astype(f32)                                        # (H,)

    VMEM = pltpu.MemorySpace.VMEM
    SMEM = pltpu.MemorySpace.SMEM

    # ---------------- stage 1: projections computed once per token ----------------
    TP = TQ
    num_p = N // TP
    proj_weights = (wq_cat, bq_cat, wkv_cat, bkv_cat)
    proj_weight_bytes = sum(int(w.size) * w.dtype.itemsize for w in proj_weights)
    proj_vmem = (proj_weight_bytes
                 + 2 * (TP * D * 4 + TP * 2 * HD * 2 + TP * 3 * HD * 2))     # dbl-buffered tiles

    q_proj, kv_proj = pl.pallas_call(
        _make_proj_kernel(D),
        out_shape=(jax.ShapeDtypeStruct((B, N, 2 * HD), bf16),
                   jax.ShapeDtypeStruct((B, N, 3 * HD), bf16)),
        grid_spec=pltpu.PrefetchScalarGridSpec(
            num_scalar_prefetch=0,
            grid=(B, num_p),
            in_specs=[pl.BlockSpec((1, TP, D), lambda b, i: (b, i, 0)),
                      pl.BlockSpec(memory_space=VMEM),
                      pl.BlockSpec(memory_space=VMEM),
                      pl.BlockSpec(memory_space=VMEM),
                      pl.BlockSpec(memory_space=VMEM)],
            out_specs=[pl.BlockSpec((1, TP, 2 * HD), lambda b, i: (b, i, 0)),
                       pl.BlockSpec((1, TP, 3 * HD), lambda b, i: (b, i, 0))]),
        compiler_params=pltpu.CompilerParams(
            dimension_semantics=("parallel", "parallel"),
            vmem_limit_bytes=_vmem_limit(proj_vmem)),
        cost_estimate=pl.CostEstimate(
            flops=int(2 * B * N * D * 5 * HD),
            transcendentals=0,
            bytes_accessed=int(4 * x.size + 2 * B * N * 5 * HD + proj_weight_bytes)),
    )(x, wq_cat, bq_cat, wkv_cat, bkv_cat)

    # ---------------- stage 2: flash-style differential attention + fused epilogue ----------------
    attn_weights = (wo, bo, w1, w2, w3)
    attn_weight_bytes = sum(int(w.size) * w.dtype.itemsize for w in attn_weights)
    attn_vmem = (attn_weight_bytes
                 + 2 * (TQ * D * 4 + TQ * 2 * HD * 2 + TK * 3 * HD * 2 + TQ * D * 4)
                 + 4 * H * TQ * 128 * 4            # m/l scratch (lane padded)
                 + 2 * H * TQ * max(D, 128) * 4    # acc scratch
                 + TQ * HD * 2)                    # diff staging slab

    kernel = _make_attn_ffn_kernel(H, D)

    grid_spec = pltpu.PrefetchScalarGridSpec(
        num_scalar_prefetch=0,
        grid=(B, num_q, num_kv),
        in_specs=[pl.BlockSpec((1, TQ, D), lambda b, qi, ki: (b, qi, 0)),        # x (residual)
                  pl.BlockSpec((1, TQ, 2 * HD), lambda b, qi, ki: (b, qi, 0)),   # [q1|q2]
                  pl.BlockSpec((1, TK, 3 * HD), lambda b, qi, ki: (b, ki, 0)),   # [k1|k2|v]
                  pl.BlockSpec(memory_space=SMEM),                               # lambda (H,)
                  pl.BlockSpec(memory_space=VMEM),                               # wo
                  pl.BlockSpec(memory_space=VMEM),                               # bo
                  pl.BlockSpec(memory_space=VMEM),                               # w1
                  pl.BlockSpec(memory_space=VMEM),                               # w2
                  pl.BlockSpec(memory_space=VMEM)],                              # w3
        out_specs=pl.BlockSpec((1, TQ, D), lambda b, qi, ki: (b, qi, 0)),
        scratch_shapes=[
            pltpu.VMEM((H, TQ, 1), f32),     # m1
            pltpu.VMEM((H, TQ, 1), f32),     # l1
            pltpu.VMEM((H, TQ, D), f32),     # acc1
            pltpu.VMEM((H, TQ, 1), f32),     # m2
            pltpu.VMEM((H, TQ, 1), f32),     # l2
            pltpu.VMEM((H, TQ, D), f32),     # acc2
            pltpu.VMEM((TQ, HD), bf16),      # per-head diff staging -> single wide Wo matmul
        ],
    )

    cost = pl.CostEstimate(
        flops=int(B * (8 * H * N * N * D      # QK^T (x2) and PV (x2) per head
                       + 2 * N * HD * D       # output projection (one wide matmul)
                       + 24 * N * D * D)),    # SwiGLU FFN (hidden = 4D)
        transcendentals=int(B * (2 * H * N * N + 4 * N * D)),
        bytes_accessed=int(B * (4 * N * D                 # x residual (once per q tile)
                                + 2 * N * 2 * HD          # q (once per q tile)
                                + 2 * N * 3 * HD * num_q  # kv re-read per q tile
                                + 4 * N * D)              # output
                           + attn_weight_bytes),
    )

    return pl.pallas_call(
        kernel,
        out_shape=jax.ShapeDtypeStruct((B, N, D), x.dtype),
        grid_spec=grid_spec,
        compiler_params=pltpu.CompilerParams(
            dimension_semantics=("parallel", "parallel", "arbitrary"),
            vmem_limit_bytes=_vmem_limit(attn_vmem)),
        cost_estimate=cost,
    )(x, q_proj, kv_proj, lam, wo, bo, w1, w2, w3)


# ---------------- pure-JAX reference (mirrors the PyTorch forward, eval mode) ----------------
def reference_block(x, params, *, heads: int, lambda_init: float):
    D = x.shape[-1]
    scale = D ** (-0.5)

    def rmsnorm(v):
        nrm = jnp.maximum(jnp.sqrt(jnp.sum(v * v, axis=-1, keepdims=True)), 1e-12)
        return v / nrm * scale

    def attn(xn):
        outs = []
        s = 1.0 / sqrt(D)
        for i in range(heads):
            lam = (jnp.exp(jnp.sum(params["lambda_q1"][i] * params["lambda_k1"][i]))
                   - jnp.exp(jnp.sum(params["lambda_q2"][i] * params["lambda_k2"][i]))
                   + lambda_init)
            q = xn @ params["wq"][i].T + params["bq"][i]
            k = xn @ params["wk"][i].T + params["bk"][i]
            v = xn @ params["wv"][i].T + params["bv"][i]
            q1, q2 = q[..., :D], q[..., D:]
            k1, k2 = k[..., :D], k[..., D:]
            a1 = jnp.einsum("bnd,bmd->bnm", q1, k1) * s
            a2 = jnp.einsum("bnd,bmd->bnm", q2, k2) * s
            outs.append((jax.nn.softmax(a1, -1) - lam * jax.nn.softmax(a2, -1)) @ v)
        oc = jnp.concatenate(outs, axis=-1)
        return (oc @ params["wo"].T + params["bo"]) * (1.0 - lambda_init)

    def ffn(v):
        return (jax.nn.silu(v @ params["w1"].T) * (v @ params["w3"].T)) @ params["w2"].T

    a = attn(rmsnorm(x)) + x
    return ffn(rmsnorm(a)) + a


def init_params(key, heads: int, D: int):
    ks = jax.random.split(key, 16)
    sd = 1.0 / sqrt(D)
    sh = 1.0 / sqrt(heads * D)
    s4 = 1.0 / sqrt(4 * D)
    return {
        "wq": jax.random.normal(ks[0], (heads, 2 * D, D), jnp.float32) * sd,
        "bq": jax.random.normal(ks[1], (heads, 2 * D), jnp.float32) * sd,
        "wk": jax.random.normal(ks[2], (heads, 2 * D, D), jnp.float32) * sd,
        "bk": jax.random.normal(ks[3], (heads, 2 * D), jnp.float32) * sd,
        "wv": jax.random.normal(ks[4], (heads, D, D), jnp.float32) * sd,
        "bv": jax.random.normal(ks[5], (heads, D), jnp.float32) * sd,
        "wo": jax.random.normal(ks[6], (D, heads * D), jnp.float32) * sh,
        "bo": jax.random.normal(ks[7], (D,), jnp.float32) * sh,
        "lambda_q1": jax.random.normal(ks[8], (heads, D), jnp.float32) * 0.1,
        "lambda_k1": jax.random.normal(ks[9], (heads, D), jnp.float32) * 0.1,
        "lambda_q2": jax.random.normal(ks[10], (heads, D), jnp.float32) * 0.1,
        "lambda_k2": jax.random.normal(ks[11], (heads, D), jnp.float32) * 0.1,
        "w1": jax.random.normal(ks[12], (4 * D, D), jnp.float32) * sd,
        "w2": jax.random.normal(ks[13], (D, 4 * D), jnp.float32) * s4,
        "w3": jax.random.normal(ks[14], (4 * D, D), jnp.float32) * sd,
    }


if __name__ == "__main__":
    B, N, D, HEADS = 2, 16, 32, 2
    LAMBDA_INIT = 0.8

    key = jax.random.PRNGKey(0)
    kx, kp = jax.random.split(key)
    x = jax.random.normal(kx, (B, N, D), jnp.float32)
    params = init_params(kp, HEADS, D)

    out = differential_transformer_block(x, params, heads=HEADS, lambda_init=LAMBDA_INIT)
    out = jax.block_until_ready(out)

    ref = jax.block_until_ready(
        reference_block(x, params, heads=HEADS, lambda_init=LAMBDA_INIT))

    assert out.shape == (B, N, D) and out.dtype == jnp.float32
    assert jnp.allclose(out, ref, rtol=2e-2, atol=2e-2), (
        f"max abs err {float(jnp.max(jnp.abs(out - ref)))}")
    print("KERNEL_OK")
</pallas_src>

<mosaic_0001>
module attributes {stable_mosaic.version = 11 : i64} {
  func.func @kernel(%arg0: i32, %arg1: i32, %arg2: memref<1x16x32xf32, #tpu.memory_space<vmem>>, %arg3: memref<32x128xbf16, #tpu.memory_space<vmem>>, %arg4: memref<1x128xf32, #tpu.memory_space<vmem>>, %arg5: memref<32x192xbf16, #tpu.memory_space<vmem>>, %arg6: memref<1x192xf32, #tpu.memory_space<vmem>>, %arg7: memref<1x16x128xbf16, #tpu.memory_space<vmem>>, %arg8: memref<1x16x192xbf16, #tpu.memory_space<vmem>>) attributes {dimension_semantics = [#tpu.dimension_semantics<parallel>, #tpu.dimension_semantics<parallel>], iteration_bounds = array<i64: 2, 1>, scalar_prefetch = 0 : i64, scratch_operands = 0 : i64, tpu.core_type = #tpu.core_type<tc>, window_params = [{transform_indices = @transform_0, window_bounds = array<i64: 1, 16, 32>}, {pipeline_mode = #tpu.pipeline_mode<synchronous>, transform_indices = @transform_1, window_bounds = array<i64: 32, 128>}, {pipeline_mode = #tpu.pipeline_mode<synchronous>, transform_indices = @transform_2, window_bounds = array<i64: 1, 128>}, {pipeline_mode = #tpu.pipeline_mode<synchronous>, transform_indices = @transform_3, window_bounds = array<i64: 32, 192>}, {pipeline_mode = #tpu.pipeline_mode<synchronous>, transform_indices = @transform_4, window_bounds = array<i64: 1, 192>}, {transform_indices = @transform_5, window_bounds = array<i64: 1, 16, 128>}, {transform_indices = @transform_6, window_bounds = array<i64: 1, 16, 192>}]} {
    %c0 = arith.constant 0 : index
    %c0_0 = arith.constant 0 : index
    %c0_1 = arith.constant 0 : index
    %0 = vector.load %arg2[%c0, %c0_0, %c0_1] : memref<1x16x32xf32, #tpu.memory_space<vmem>>, vector<1x16x32xf32>
    %1 = vector.shape_cast %0 : vector<1x16x32xf32> to vector<16x32xf32>
    %2 = arith.mulf %1, %1 : vector<16x32xf32>
    %cst = arith.constant dense<0.000000e+00> : vector<16xf32>
    %3 = vector.multi_reduction <add>, %2, %cst [1] : vector<16x32xf32> to vector<16xf32>
    %4 = vector.shape_cast %3 : vector<16xf32> to vector<16x1xf32>
    %5 = math.sqrt %4 : vector<16x1xf32>
    %cst_2 = arith.constant 9.99999996E-13 : f32
    %6 = vector.broadcast %cst_2 : f32 to vector<16x1xf32>
    %7 = arith.maximumf %5, %6 : vector<16x1xf32>
    %8 = vector.broadcast %7 : vector<16x1xf32> to vector<16x32xf32>
    %9 = arith.divf %1, %8 : vector<16x32xf32>
    %cst_3 = arith.constant 0.176776692 : f32
    %10 = vector.broadcast %cst_3 : f32 to vector<16x32xf32>
    %11 = arith.mulf %9, %10 : vector<16x32xf32>
    %12 = arith.truncf %11 : vector<16x32xf32> to vector<16x32xbf16>
    %c0_4 = arith.constant 0 : index
    %c0_5 = arith.constant 0 : index
    %13 = vector.load %arg3[%c0_4, %c0_5] : memref<32x128xbf16, #tpu.memory_space<vmem>>, vector<32x128xbf16>
    %cst_6 = arith.constant dense<0.000000e+00> : vector<16x128xf32>
    %14 = tpu.matmul %12, %13, %cst_6 {dimension_numbers = #tpu.dot_dimension_numbers<[1], [0], [0], [1], [0, 0, 1, 1], [], []>} : vector<16x32xbf16>, vector<32x128xbf16>, vector<16x128xf32> -> vector<16x128xf32>
    %c0_7 = arith.constant 0 : index
    %c0_8 = arith.constant 0 : index
    %15 = vector.load %arg4[%c0_7, %c0_8] : memref<1x128xf32, #tpu.memory_space<vmem>>, vector<1x128xf32>
    %16 = vector.broadcast %15 : vector<1x128xf32> to vector<16x128xf32>
    %17 = arith.addf %14, %16 : vector<16x128xf32>
    %18 = arith.truncf %17 : vector<16x128xf32> to vector<16x128xbf16>
    %c0_9 = arith.constant 0 : index
    %c0_10 = arith.constant 0 : index
    %c0_11 = arith.constant 0 : index
    %19 = vector.load %arg7[%c0_9, %c0_10, %c0_11] : memref<1x16x128xbf16, #tpu.memory_space<vmem>>, vector<1x16x128xbf16>
    %20 = vector.shape_cast %19 : vector<1x16x128xbf16> to vector<16x128xbf16>
    %21 = vector.shape_cast %18 : vector<16x128xbf16> to vector<1x16x128xbf16>
    tpu.vector_store %arg7[%c0_9, %c0_10, %c0_11], %21 {strides = array<i32>} : memref<1x16x128xbf16, #tpu.memory_space<vmem>>, vector<1x16x128xbf16>,
    %c0_12 = arith.constant 0 : index
    %c0_13 = arith.constant 0 : index
    %22 = vector.load %arg5[%c0_12, %c0_13] : memref<32x192xbf16, #tpu.memory_space<vmem>>, vector<32x192xbf16>
    %cst_14 = arith.constant dense<0.000000e+00> : vector<16x192xf32>
    %23 = tpu.matmul %12, %22, %cst_14 {dimension_numbers = #tpu.dot_dimension_numbers<[1], [0], [0], [1], [0, 0, 1, 1], [], []>} : vector<16x32xbf16>, vector<32x192xbf16>, vector<16x192xf32> -> vector<16x192xf32>
    %c0_15 = arith.constant 0 : index
    %c0_16 = arith.constant 0 : index
    %24 = vector.load %arg6[%c0_15, %c0_16] : memref<1x192xf32, #tpu.memory_space<vmem>>, vector<1x192xf32>
    %25 = vector.broadcast %24 : vector<1x192xf32> to vector<16x192xf32>
    %26 = arith.addf %23, %25 : vector<16x192xf32>
    %27 = arith.truncf %26 : vector<16x192xf32> to vector<16x192xbf16>
    %c0_17 = arith.constant 0 : index
    %c0_18 = arith.constant 0 : index
    %c0_19 = arith.constant 0 : index
    %28 = vector.load %arg8[%c0_17, %c0_18, %c0_19] : memref<1x16x192xbf16, #tpu.memory_space<vmem>>, vector<1x16x192xbf16>
    %29 = vector.shape_cast %28 : vector<1x16x192xbf16> to vector<16x192xbf16>
    %30 = vector.shape_cast %27 : vector<16x192xbf16> to vector<1x16x192xbf16>
    tpu.vector_store %arg8[%c0_17, %c0_18, %c0_19], %30 {strides = array<i32>} : memref<1x16x192xbf16, #tpu.memory_space<vmem>>, vector<1x16x192xbf16>,
    return
  }
  func.func @transform_0(%arg0: i32, %arg1: i32) -> (i32, i32, i32) {
    %c0_i32 = arith.constant 0 : i32
    %c0_i32_0 = arith.constant 0 : i32
    return %arg0, %arg1, %c0_i32 : i32, i32, i32
  }
  func.func @transform_1(%arg0: i32, %arg1: i32) -> (i32, i32) {
    %c0_i32 = arith.constant 0 : i32
    %c0_i32_0 = arith.constant 0 : i32
    %c0_i32_1 = arith.constant 0 : i32
    return %c0_i32, %c0_i32_0 : i32, i32
  }
  func.func @transform_2(%arg0: i32, %arg1: i32) -> (i32, i32) {
    %c0_i32 = arith.constant 0 : i32
    %c0_i32_0 = arith.constant 0 : i32
    %c0_i32_1 = arith.constant 0 : i32
    return %c0_i32, %c0_i32_0 : i32, i32
  }
  func.func @transform_3(%arg0: i32, %arg1: i32) -> (i32, i32) {
    %c0_i32 = arith.constant 0 : i32
    %c0_i32_0 = arith.constant 0 : i32
    %c0_i32_1 = arith.constant 0 : i32
    return %c0_i32, %c0_i32_0 : i32, i32
  }
  func.func @transform_4(%arg0: i32, %arg1: i32) -> (i32, i32) {
    %c0_i32 = arith.constant 0 : i32
    %c0_i32_0 = arith.constant 0 : i32
    %c0_i32_1 = arith.constant 0 : i32
    return %c0_i32, %c0_i32_0 : i32, i32
  }
  func.func @transform_5(%arg0: i32, %arg1: i32) -> (i32, i32, i32) {
    %c0_i32 = arith.constant 0 : i32
    %c0_i32_0 = arith.constant 0 : i32
    return %arg0, %arg1, %c0_i32 : i32, i32, i32
  }
  func.func @transform_6(%arg0: i32, %arg1: i32) -> (i32, i32, i32) {
    %c0_i32 = arith.constant 0 : i32
    %c0_i32_0 = arith.constant 0 : i32
    return %arg0, %arg1, %c0_i32 : i32, i32, i32
  }
}

</mosaic_0001>

<bundles_post_ra>
// kernel: tpu_custom_call.1
= control target key start
LH: loop header
LB: loop body
LE: loop exit
PB: predicated region body
PF: predicated region fallthrough
CT: control target
= control target key end

     0   :  { %12 = vsyncpa [#allocation3], 0  ;;  %s1465_s0 = inlined_call_operand.hbm [shape: f32[2,16,32], index: 0, kind: input, shape index: {}]   ;;  %s1466_s1 = inlined_call_operand.hbm [shape: bf16[32,128], index: 1, kind: input, shape index: {}]   ;;  %s1467_s2 = inlined_call_operand.vmem [shape: f32[1,128], index: 2, kind: input, shape index: {}]   ;;  %s1468_s3 = inlined_call_operand.hbm [shape: bf16[32,192], index: 3, kind: input, shape index: {}]   ;;  %s1469_s4 = inlined_call_operand.vmem [shape: f32[1,192], index: 4, kind: input, shape index: {}]   ;;  %s1470_s5 = inlined_call_operand.hbm [shape: bf16[2,16,128], index: 5, kind: output, shape index: {0}]   ;;  %s1471_s6 = inlined_call_operand.hbm [shape: bf16[2,16,192], index: 6, kind: output, shape index: {1}]  }
   0x1   :  { %14 = vsyncpa [#allocation3 + $0x1], 0 }
   0x2   :  { %15 = vsyncpa [#allocation6], 0 }
   0x3   :  { %16 = vsyncpa [#allocation4], 0 }
   0x4   :  { %18 = vsyncpa [#allocation4 + $0x1], 0 }
   0x5   :  { %19 = vsyncpa [#allocation10], 0 }
   0x6   :  { %21 = vsyncpa [#allocation10 + $0x1], 0  ;;  %s1153_s21 = smov 0   ;;  %s1155_s22 = smov 0  }
   0x7   :  { %s1157_s23 = smov 0   ;;  %s1159_s24 = smov 0  }
   0x8   :  { %s1161_s25 = smov 0   ;;  %s1163_s26 = smov 0  }
   0x9 LB: > { %s722_s27 = sadd.s32 4294967295, %s1100_s26   ;;  %s723_s28 = sadd.s32 4294967294, %s1100_s26   ;;  %s1100_s26 = sphi %s1163_s26, %s27_s26   ;;  %s1096_s25 = sphi %s1161_s25, %s1498_s25   ;;  %s1092_s24 = sphi %s1159_s24, %s1497_s24   ;;  %s1088_s23 = sphi %s1157_s23, %s1496_s23   ;;  %s1084_s22 = sphi %s1155_s22, %s1495_s22   ;;  %s1080_s21 = sphi %s1153_s21, %s1494_s21  }
   0xa   : > { %p61_p0 = scmp.ne.s32.totalorder %s1084_s22, %s1080_s21  ;;  %p1187_p1 = scmp.eq.s32.totalorder %s722_s27, 0 }
   0xb   : > { %p1191_p2 = scmp.eq.s32.totalorder %s722_s27, 1  ;;  %p177_p3 = scmp.eq.s32.totalorder %s723_s28, 1 }
   0xc   : > { %s1478_s29 = scalar_select %p1187_p1, 1, 0 }
   0xd   : > { %p1197_p4 = por %p1187_p1, %p61_p0  ;;  %p724_p5 = scmp.ge.s32.totalorder %s1100_s26, 1 }
   0xe   : > { %p1202_p6 = por %p177_p3, %p61_p0  ;;  %p212_p7 = scmp.lt.s32.totalorder %s1100_s26, 3 }
   0xf   : > { %s1480_s7 = scalar_select %p1197_p4, 1, 0 }
  0x10   : > { %s1481_s8 = scalar_select %p1202_p6, 1, 0 }
  0x11   : > { %p1207_p8 = pnand %p724_p5, %p212_p7  ;;  %s1102_s10 = smov [#allocation5]  }
  0x12   : > { %1482 = sst [smem:[#allocation15_spill]] %s1481_s8  ;;  %s224_s11 = sshll.u32 %s1102_s10, 4  ;;  %s1211_s11 = int_to_ptr.vmem [resolvable:$true] %s224_s11 }
  0x13   : > { %p795_p9 = pneg %p1207_p8  ;;  %s1103_s13 = smov [#allocation7]  }
  0x14   : > { %s240_s14 = sshll.u32 %s1103_s13, 4  ;;  %s896_s17 = scalar_lea.hbm %s1466_s1, 256  ;;  %s1222_s14 = int_to_ptr.vmem [resolvable:$true] %s240_s14 }
  0x15   : > { %p1218_p11 = pnand %p795_p9, %p1187_p1  ;;  %p897_p12 = scmp.ne.s32.totalorder %s1466_s1, %s896_s17 }
  0x16   : > { %p903_p5 = scmp.lt.u32.totalorder %s896_s17, %s1466_s1 }
  0x17   : > { %p898_p13 = pneg %p1218_p11 }
  0x19   : > { %p899_p0 = pnand %p898_p13, %p897_p12 }
  0x1b   : > { %p900_p3 = pneg %p899_p0 }
  0x1d   : > { %p905_p7 = pnand %p903_p5, %p900_p3 }
  0x1f   : > { %908 = shalt.err (!%p905_p7)
}
  0x20   : > { %s909_s28 = scalar_lea.vmem %s1211_s11, 256  ;;  %p917_p1 = scmp.lt.s32.totalorder %s1211_s11, %s1211_s11 }
  0x21   : > { %p910_p9 = scmp.ne.s32.totalorder %s1211_s11, %s909_s28  ;;  %p918_p12 = scmp.lt.s32.totalorder %s909_s28, %s909_s28 }
  0x23   : > { %p912_p10 = pnand %p910_p9, %p898_p13  ;;  %p919_p0 = por %p918_p12, %p917_p1 }
  0x25   : > { %p913_p6 = pneg %p912_p10 }
  0x27   : > { %p920_p4 = pnand %p919_p0, %p913_p6 }
  0x29   : > { %923 = shalt.err (!%p920_p4)
}
  0x2a   : > { %s1104_s10 = smov 64   ;;  %s1105_s13 = smov 4  }
  0x2b   : > { %798 = dma.hbm_to_vmem [thread:$0]  (!%p1218_p11), %s1466_s1, 256, %s1211_s11, [#allocation6], %s1104_s10, %s1104_s10, %s1105_s13  }
  0x2c   : > { %s924_s19 = scalar_lea.hbm %s1468_s3, 512 }
  0x2d   : > { %p925_p1 = scmp.ne.s32.totalorder %s1468_s3, %s924_s19  ;;  %p931_p10 = scmp.lt.u32.totalorder %s924_s19, %s1468_s3 }
  0x2f   : > { %p927_p4 = pnand %p925_p1, %p898_p13 }
  0x31   : > { %p928_p6 = pneg %p927_p4 }
  0x33   : > { %p933_p3 = pnand %p931_p10, %p928_p6 }
  0x35   : > { %936 = shalt.err (!%p933_p3)
}
  0x36   : > { %s937_s11 = scalar_lea.vmem %s1222_s14, 512  ;;  %p945_p12 = scmp.lt.s32.totalorder %s1222_s14, %s1222_s14 }
  0x37   : > { %p938_p5 = scmp.ne.s32.totalorder %s1222_s14, %s937_s11  ;;  %p946_p0 = scmp.lt.s32.totalorder %s937_s11, %s937_s11 }
  0x39   : > { %p940_p7 = pnand %p938_p5, %p898_p13  ;;  %p947_p1 = por %p946_p0, %p945_p12 }
  0x3b   : > { %p941_p9 = pneg %p940_p7 }
  0x3d   : > { %p948_p4 = pnand %p947_p1, %p941_p9 }
  0x3f   : > { %951 = shalt.err (!%p948_p4)
}
  0x40   : > { %s1476_s8 = smov 128   ;;  %s1107_s10 = smov 8  }
  0x41   : > { %801 = dma.hbm_to_vmem [thread:$0]  (!%p1218_p11), %s1468_s3, 512, %s1222_s14, [#allocation6], %s1476_s8, %s1476_s8, %s1107_s10  }
  0x42   : > { %s39_s16 = sadd.s32 1, %s1096_s25  ;;  %s48_s17 = sadd.s32 1, %s1088_s23 }
  0x43   : > { %p41_p13 = scmp.ge.s32.totalorder %s39_s16, 2  ;;  %p55_p6 = scmp.ne.s32.totalorder %s1088_s23, %s1084_s22 }
  0x44   : > { %p56_p10 = scmp.eq.s32.totalorder %s1100_s26, 0  ;;  %p815_p3 = scmp.lt.s32.totalorder %s1100_s26, 2 }
  0x45   : > { %s1500_s16 = smov (%p41_p13, %s39_s16), 0  ;;  %p1289_p7 = por %p1191_p2, %p55_p6 }
  0x46   : > { %p57_p5 = por %p56_p10, %p55_p6  ;;  %s43_s18 = ssub.s32 %s1096_s25, %s1500_s16 }
  0x47   : > { %s1485_s12 = scalar_select %p1289_p7, 1, 0 }
  0x48   : > { %s257_s19 = sand.u32 1, %s1088_s23   ;;  %p46_p9 = scmp.eq.s32.totalorder %s43_s18, 0 }
  0x49   : > { %s728_s14 = sshll.u32 %s257_s19, 4  ;;  %s758_s20 = sshll.u32 %s1096_s25, 8 }
  0x4a   : > { %s1298_s27 = scalar_select %p46_p9, %s1088_s23, %s48_s17  }
  0x4b   : > { %s1303_s13 = scalar_lea.hbm %s1465_s0, %s758_s20  ;;  %s261_s30 = scalar_lea.vmem [#allocation2], %s728_s14 }
  0x4c   : > { %s270_s15 = sshll.u32 %s261_s30, 4  ;;  %p1307_p2 = pnand %p815_p3, %p57_p5  ;;  %s1311_s15 = int_to_ptr.vmem [resolvable:$true] %s270_s15 }
  0x4d   : > { %s1313_s17 = scalar_lea.sflag [#allocation3], %s257_s19  ;;  %s952_s18 = scalar_lea.hbm %s1303_s13, 256 }
  0x4e   : > { %p953_p11 = scmp.ne.s32.totalorder %s1303_s13, %s952_s18  ;;  %p954_p12 = pneg %p1307_p2 }
  0x4f   : > { %s957_s28 = scalar_lea.hbm %s1465_s0, 512  ;;  %p958_p4 = scmp.lt.u32.totalorder %s1303_s13, %s1465_s0 }
  0x50   : > { %p955_p0 = pnand %p954_p12, %p953_p11  ;;  %p959_p13 = scmp.lt.u32.totalorder %s957_s28, %s952_s18 }
  0x51   : > { %p961_p10 = scmp.lt.u32.totalorder %s952_s18, %s1303_s13 }
  0x52   : > { %p956_p1 = pneg %p955_p0  ;;  %p960_p6 = por %p959_p13, %p958_p4 }
  0x54   : > { %p962_p3 = por %p961_p10, %p960_p6 }
  0x56   : > { %p963_p5 = pnand %p962_p3, %p956_p1 }
  0x58   : > { %966 = shalt.err (!%p963_p5)
}
  0x59   : > { %s967_s19 = scalar_lea.vmem %s1311_s15, 256  ;;  %s1108_s14 = smov [#allocation2]  }
  0x5a   : > { %p968_p9 = scmp.ne.s32.totalorder %s1311_s15, %s967_s19  ;;  %s972_s20 = sshll.u32 %s1108_s14, 4  ;;  %s973_s20 = int_to_ptr.vmem [resolvable:$false] %s972_s20 }
  0x5b   : > { %s974_s11 = scalar_lea.vmem %s973_s20, 512  ;;  %p975_p7 = scmp.lt.s32.totalorder %s1311_s15, %s973_s20 }
  0x5c   : > { %p970_p11 = pnand %p968_p9, %p954_p12  ;;  %p976_p4 = scmp.lt.s32.totalorder %s974_s11, %s967_s19 }
  0x5e   : > { %p971_p0 = pneg %p970_p11  ;;  %p977_p13 = por %p976_p4, %p975_p7 }
  0x60   : > { %p978_p6 = pnand %p977_p13, %p971_p0 }
  0x62   : > { %981 = shalt.err (!%p978_p6)
}
  0x63   : > { %s1487_s18 = smov 128   ;;  %282 = sbr.rel (%p1207_p8) target bundleno = 552 (0x228), region = 40 }
  0x64   : > { %805 = dma.hbm_to_vmem [thread:$0]  (!%p1307_p2), %s1303_s13, 256, %s1311_s15, %s1313_s17, %s1487_s18, %s1487_s18, %s1107_s10  }
  0x65   : > { %s1347_s28 = sand.u32 (!%p1207_p8), 1, %s1084_s22   ;;  %p1488_p7 = scmp.ne.s32.totalorder (!%p1207_p8), %s1480_s7, 0 }
  0x66   : > { %s732_s30 = sshll.u32 (!%p1207_p8), %s1347_s28, 4  ;;  %s285_s19 = scalar_lea.sflag (!%p1207_p8), [#allocation3], %s1347_s28 }
  0x67   : > { %s288_s8 = scalar_lea.vmem (!%p1207_p8), [#allocation2], %s732_s30 }
  0x6a   : > { %1063 = dma.done.wait (%p1488_p7), %s285_s19, 256  }
  0x6b   : > { %1065 = vsyncadd (%p1488_p7), %s285_s19, 4294967040  ;;  %p1489_p2 = scmp.ne.s32.totalorder %s1478_s29, 0 }
  0x6d   : > { %1067 = dma.done.wait (%p1489_p2), [#allocation6], 768  }
  0x6e   : > { %1069 = vsyncadd (%p1489_p2), [#allocation6], 4294966528  ;;  %v334_v0 = vld [vmem:[%s288_s8] sm:$0xff]  ;;  %vm338_vm0 = vcmask 261120   ;;  %v335_v1 = vld [vmem:[%s288_s8 + $0x8] sm:$0xff]  ;;  %v1109_v9 = vmov 0.0   ;;  %v451_v35 = vlaneseq }
  0x6f   : > { %v336_v2 = vmul.f32 %v334_v0, %v334_v0  ;;  %v337_v3 = vmul.f32 %v335_v1, %v335_v1  ;;  %v880_v6 = vld [vmem:[#allocation7 + $0x4] ss:$8 sps:$4 sm:$0xff]   ;;  %v882_v7 = vld [vmem:[#allocation5] sm:$0xff]   ;;  %v883_v8 = vld [vmem:[#allocation7] ss:$8 sps:$4 sm:$0xff]   ;;  %773 = vmatprep.subr.bf16.mxu0 %v1109_v9  ;;  %vm1110_vm1 = vmmov 0  }
  0x70   : > { %v884_v10 = vld [vmem:[#allocation7 + $0x14] ss:$8 sps:$4 sm:$0xff]   ;;  %481 = vmatprep.subr.bf16.mxu1 %v880_v6  ;;  %774 = vmatpush3.bf16.msra.mxu0 %v882_v7  ;;  %v887_v12 = vld [vmem:[#allocation7 + $0x10] ss:$8 sps:$4 sm:$0xff]   ;;  %v1111_v13 = vmov 0   ;;  %v452_v36 = vshrl.u32 %v451_v35, 7 }
  0x71   : > { %v339_v4 = vsel %vm338_vm0, %v336_v2, 0.0  ;;  %v342_v5 = vsel %vm338_vm0, %v337_v3, 0.0  ;;  %v886_v11 = vld [vmem:[#allocation5 + $0x8] sm:$0xff]   ;;  %482 = vmatpush1.bf16.msra.mxu1 %v883_v8  ;;  %775 = vmatprep.subr.bf16.mxu0 %v1109_v9  ;;  %s735_s29 = sshll.u32 %s1347_s28, 3  ;;  %v449_v38 = vld [vmem:[%s1469_s4] sm:$0x3] }
  0x72   : > { %340 = vadd.xlane.f32.xlu0 %v339_v4  ;;  %483 = vmatprep.subr.bf16.mxu1 %v884_v10  ;;  %v453_v37 = vsub.s32 0, %v452_v36  ;;  %v457_v39 = vsub.s32 1, %v452_v36  ;;  %s1369_s10 = scalar_lea.vmem [#allocation8], %s735_s29  ;;  %v737_v42 = vld [vmem:[%s1467_s2] ss:$0 sm:$0xff]  ;;  %vm536_vm6 = vcmask 1043456  }
  0x73   : > { %777 = vmatprep.mubr.msk.bf16.mxu0 %vm1110_vm1, %v1109_v9  ;;  %513 = vmatprep.mubr.bf16.mxu1 %v1111_v13  ;;  %s562_s13 = sshll.u32 %s1369_s10, 4  ;;  %vm537_vm7 = vcmask 523268   ;;  %s763_s14 = sshll.u32 %s1092_s24, 7  ;;  %s1376_s13 = int_to_ptr.vmem [resolvable:$true] %s562_s13 }
  0x74   : > { %776 = vmatpush3.bf16.msra.mxu0 %v886_v11  ;;  %v454_v40 = vrot.slane %v449_v38, %v453_v37  ;;  %v458_v41 = vrot.slane %v449_v38, %v457_v39  ;;  %s764_s20 = sshll.u32 %s1092_s24, 8  ;;  %s329_s11 = scalar_lea.vmem [#allocation9], %s732_s30  ;;  %vm538_vm8 = vmor %vm537_vm7, %vm536_vm6 }
  0x75   : > { %484 = vmatpush1.bf16.msra.mxu1 %v887_v12  ;;  %s581_s18 = sshll.u32 %s329_s11, 4  ;;  %s1384_s29 = scalar_lea.hbm %s1470_s5, %s763_s14  ;;  %s1391_s18 = int_to_ptr.vmem [resolvable:$true] %s581_s18 }
  0x76   : > { %343 = vadd.xlane.f32.xlu0 %v342_v5  ;;  %s1389_s7 = scalar_lea.hbm %s1471_s6, %s764_s20  ;;  %s542_s9 = scalar_lea.sflag [#allocation4], %s1347_s28 }
  0x77   : > { %s982_s15 = scalar_lea.vmem %s1376_s13, 128  ;;  %p1490_p12 = scmp.ne.s32.totalorder %s1485_s12, 0 }
  0x78   : > { %p983_p8 = scmp.ne.s32.totalorder %s1376_s13, %s982_s15  ;;  %s1112_s17 = smov [#allocation8]  }
  0x79   : > { %s986_s14 = sshll.u32 %s1112_s17, 4  ;;  %s987_s14 = int_to_ptr.vmem [resolvable:$false] %s986_s14 }
  0x7a   : > { %p984_p1 = pnand %p983_p8, %p1490_p12  ;;  %s988_s19 = scalar_lea.vmem %s987_s14, 256 }
  0x7b   : > { %p989_p3 = scmp.lt.s32.totalorder %s1376_s13, %s987_s14  ;;  %p990_p5 = scmp.lt.s32.totalorder %s988_s19, %s982_s15 }
  0x7c   : > { %p985_p10 = pneg %p984_p1 }
  0x7d   : > { %p991_p9 = por %p990_p5, %p989_p3 }
  0x7f   : > { %p992_p11 = pnand %p991_p9, %p985_p10 }
  0xff   : > { %v341_v14 = vpop.xlane.xlu0 %340 }
 0x100   : > { %888 = vrsqrt.f32 %v341_v14  ;;  %vm347_vm2 = vcmp.eq.f32.partialorder %v341_v14, inf  ;;  %v350_v18 = vand.u32 2147483648, %v341_v14  ;;  %vm349_vm3 = vcmp.eq.f32.partialorder %v341_v14, 0.0 }
 0x103   : > { %v344_v15 = vpop.xlane.xlu0 %343 }
 0x104   : > { %890 = vrsqrt.f32 %v344_v15  ;;  %vm354_vm4 = vcmp.eq.f32.partialorder %v344_v15, inf  ;;  %v357_v24 = vand.u32 2147483648, %v344_v15  ;;  %vm356_vm5 = vcmp.eq.f32.partialorder %v344_v15, 0.0 }
 0x10a   : > { %v889_v16 = vpop.eup %888 }
 0x10b   : > { %v346_v17 = vmul.f32 %v889_v16, %v341_v14 }
 0x10d   : > { %v348_v19 = vsel %vm347_vm2, %v341_v14, %v346_v17 }
 0x10e   : > { %v891_v20 = vpop.eup %890  ;;  %v351_v21 = vsel %vm349_vm3, %v350_v18, %v348_v19 }
 0x10f   : > { %v359_v22 = vmax.f32 %v351_v21, 1e-12  ;;  %v353_v23 = vmul.f32 %v891_v20, %v344_v15 }
 0x111   : > { %892 = vrcp.f32 %v359_v22  ;;  %v355_v25 = vsel %vm354_vm4, %v344_v15, %v353_v23 }
 0x112   : > { %v358_v26 = vsel %vm356_vm5, %v357_v24, %v355_v25 }
 0x113   : > { %v360_v27 = vmax.f32 %v358_v26, 1e-12 }
 0x115   : > { %894 = vrcp.f32 %v360_v27 }
 0x11b   : > { %v893_v28 = vpop.eup %892 }
 0x11c   : > { %v362_v29 = vmul.f32 %v893_v28, %v334_v0 }
 0x11e   : > { %v365_v32 = vmul.f32 0.17677669, %v362_v29 }
 0x11f   : > { %v895_v30 = vpop.eup %894 }
 0x120   : > { %v364_v31 = vmul.f32 %v895_v30, %v335_v1 }
 0x122   : > { %v366_v33 = vmul.f32 0.17677669, %v364_v31 }
 0x124   : > { %v367_v34 = vpack.c.bf16 %v366_v33, %v365_v32 }
 0x126   : > { %778 = vmatmul.mubr.msk.bf16.vlgmr.msra.gmra.mrb[0].mxu0 %vm338_vm0, %v367_v34  ;;  %747 = vmatmul.mubr.msk.bf16.vlgmr.msra.gmra.mrb[0].mxu1 %vm338_vm0, %v367_v34 }
 0x1f9   : > { %v428_v43 = vpop.f32.mrb[0].mxu0  ;;  %v515_v44 = vpop.f32.mrb[0].mxu1 }
 0x1fa   : > { %v516_v45 = vadd.f32 %v515_v44, %v454_v40  ;;  %v779_v46 = vpop.f32.mrb[1].mxu0  ;;  %v517_v47 = vpop.f32.mrb[1].mxu1  ;;  %v429_v51 = vadd.f32 %v737_v42, %v428_v43 }
 0x1fb   : > { %v518_v48 = vadd.f32 %v517_v47, %v458_v41  ;;  %v431_v49 = vpop.f32.mrb[2].mxu0  ;;  %v519_v50 = vpop.f32.mrb[2].mxu1 }
 0x1fc   : > { %v432_v52 = vadd.f32 %v737_v42, %v431_v49  ;;  %v520_v53 = vadd.f32 %v519_v50, %v454_v40  ;;  %v780_v54 = vpop.f32.mrb[3].mxu0  ;;  %v521_v55 = vpop.f32.mrb[3].mxu1 }
 0x1fd   : > { %v761_v56 = vpack.c.bf16 %v518_v48, %v516_v45  ;;  %v522_v57 = vadd.f32 %v521_v55, %v458_v41 }
 0x1fe   : > { %v768_v58 = vpack.c.bf16 %v432_v52, %v429_v51 }
 0x1ff   : > { %539 = vst.msk [vmem:[%s329_s11] sm:$0xff] %vm538_vm8, %v761_v56  ;;  %v762_v59 = vpack.c.bf16 %v522_v57, %v520_v53 }
 0x200   : > { %769 = vst [vmem:[%s1369_s10] sm:$0xff] %v768_v58  }
 0x201   : > { %540 = vst.msk [vmem:[%s329_s11 + $0x8] sm:$0xff] %vm538_vm8, %v762_v59 }
 0x202   : > { %995 = shalt.err (!%p992_p11)
}
 0x203   : > { %s996_s10 = scalar_lea.hbm %s1384_s29, 128  ;;  %s1000_s8 = scalar_lea.hbm %s1470_s5, 256 }
 0x204   : > { %p997_p0 = scmp.ne.s32.totalorder %s1384_s29, %s996_s10  ;;  %p1001_p6 = scmp.lt.u32.totalorder %s1384_s29, %s1470_s5 }
 0x205   : > { %p1002_p7 = scmp.lt.u32.totalorder %s1000_s8, %s996_s10  ;;  %p1004_p8 = scmp.lt.u32.totalorder %s996_s10, %s1384_s29 }
 0x206   : > { %p998_p4 = pnand %p997_p0, %p1490_p12 }
 0x207   : > { %p1003_p2 = por %p1002_p7, %p1001_p6 }
 0x208   : > { %p999_p13 = pneg %p998_p4 }
 0x209   : > { %p1005_p1 = por %p1004_p8, %p1003_p2 }
 0x20b   : > { %p1006_p10 = pnand %p1005_p1, %p999_p13 }
 0x20d   : > { %1009 = shalt.err (!%p1006_p10)
}
 0x20e   : > { %s1113_s15 = smov 64   ;;  %s1114_s17 = smov 4  }
 0x20f   : > { %791 = dma.vmem_to_hbm [thread:$0]  (%p1490_p12), %s1376_s13, 128, %s1384_s29, %s542_s9, %s1113_s15, %s1113_s15, %s1114_s17  }
 0x210   : > { %s547_s14 = scalar_lea.sflag [#allocation10], %s1347_s28  ;;  %s1010_s19 = scalar_lea.vmem %s1391_s18, 256 }
 0x211   : > { %p1011_p3 = scmp.ne.s32.totalorder %s1391_s18, %s1010_s19  ;;  %s1115_s10 = smov [#allocation9]  }
 0x212   : > { %s1014_s20 = sshll.u32 %s1115_s10, 4  ;;  %s1015_s20 = int_to_ptr.vmem [resolvable:$false] %s1014_s20 }
 0x213   : > { %p1012_p5 = pnand %p1011_p3, %p1490_p12  ;;  %s1016_s11 = scalar_lea.vmem %s1015_s20, 512 }
 0x214   : > { %p1017_p11 = scmp.lt.s32.totalorder %s1391_s18, %s1015_s20  ;;  %p1018_p0 = scmp.lt.s32.totalorder %s1016_s11, %s1010_s19 }
 0x215   : > { %p1013_p9 = pneg %p1012_p5 }
 0x216   : > { %p1019_p4 = por %p1018_p0, %p1017_p11 }
 0x218   : > { %p1020_p13 = pnand %p1019_p4, %p1013_p9 }
 0x21a   : > { %1023 = shalt.err (!%p1020_p13)
}
 0x21b   : > { %s1024_s13 = scalar_lea.hbm %s1389_s7, 256  ;;  %s1028_s8 = scalar_lea.hbm %s1471_s6, 512 }
 0x21c   : > { %p1025_p6 = scmp.ne.s32.totalorder %s1389_s7, %s1024_s13  ;;  %p1029_p8 = scmp.lt.u32.totalorder %s1389_s7, %s1471_s6 }
 0x21d   : > { %p1030_p1 = scmp.lt.u32.totalorder %s1028_s8, %s1024_s13  ;;  %p1032_p3 = scmp.lt.u32.totalorder %s1024_s13, %s1389_s7 }
 0x21e   : > { %p1026_p7 = pnand %p1025_p6, %p1490_p12 }
 0x21f   : > { %p1031_p10 = por %p1030_p1, %p1029_p8 }
 0x220   : > { %p1027_p2 = pneg %p1026_p7 }
 0x221   : > { %p1033_p5 = por %p1032_p3, %p1031_p10 }
 0x223   : > { %p1034_p9 = pnand %p1033_p5, %p1027_p2 }
 0x225   : > { %1037 = shalt.err (!%p1034_p9)
}
 0x226   : > { %s1116_s15 = smov 128   ;;  %s1117_s17 = smov 8  }
 0x227   : > { %792 = dma.vmem_to_hbm [thread:$0]  (%p1490_p12), %s1391_s18, 256, %s1389_s7, %s547_s14, %s1116_s15, %s1116_s15, %s1117_s17  }
 0x228 PF: > { %s1491_s19 = sld [smem:[#allocation15_spill]]  ;;  %s596_s10 = sand.u32 1, %s1080_s21  }
 0x229   : > { %p1493_p0 = scmp.ge.s32.totalorder %s1100_s26, 2  ;;  %s597_s20 = scalar_lea.sflag [#allocation4], %s596_s10 }
 0x22e   : > { %p1492_p11 = scmp.ne.s32.totalorder %s1491_s19, 0 }
 0x230   : > { %p807_p4 = pnand %p1493_p0, %p1492_p11 }
 0x232   : > { %1071 = dma.done.wait (!%p807_p4), %s597_s20, 128  }
 0x233   : > { %1073 = vsyncadd (!%p807_p4), %s597_s20, 4294967168  ;;  %s606_s11 = scalar_lea.sflag [#allocation10], %s596_s10 }
 0x234   : > { %1075 = dma.done.wait (!%p807_p4), %s606_s11, 256  }
 0x235   : > { %1077 = vsyncadd (!%p807_p4), %s606_s11, 4294967040  ;;  %s27_s26 = sadd.s32 1, %s1100_s26   ;;  %s1494_s21 = smov %s1084_s22 }
 0x236   : > { %p24_p13 = scmp.ge.s32.totalorder %s27_s26, 4   ;;  %s1495_s22 = smov %s1088_s23 }
 0x237   : > { %s1496_s23 = smov %s1298_s27  ;;  %s1497_s24 = smov %s1096_s25 }
 0x238   : > { %s1498_s25 = smov %s1500_s16  ;;  %26 = sbr.rel (!%p24_p13) target bundleno = 9 (0x9), region = 110 }
 0x23f   :  { %611 = vsyncpa [#allocation3], 1 }
 0x240   :  { %613 = vsyncpa [#allocation3 + $0x1], 1 }
 0x241   :  { %614 = vsyncpa [#allocation6], 1 }
 0x242   :  { %615 = vsyncpa [#allocation4], 1 }
 0x243   :  { %617 = vsyncpa [#allocation4 + $0x1], 1 }
 0x244   :  { %618 = vsyncpa [#allocation10], 1 }
 0x245   :  { %620 = vsyncpa [#allocation10 + $0x1], 1 }

</bundles_post_ra>
